<compile_context>
chip_gen: v5e
topology: v5e:2x2
jax: 0.10.0
libtpu: 0.0.40
codegen_flags: <defaults>
</compile_context>

<pallas_src>
import jax
import jax.numpy as jnp
from jax.experimental import pallas as pl
from jax.experimental.pallas import tpu as pltpu

PIC_DIM = 2048
BERT_DIM = 768
HID = 100
HID_PAD = 128      # word-path hidden padded to a full lane width
OUT_DIM = 1


def _fused_head_kernel(pic_ref, cls_ref,
                       wpf_ref, ww_ref, bw_ref, wow_ref, b_ref,
                       out_ref):
    # Picture path, pre-folded outside the kernel: picture @ (Wp @ Wo_pic).
    pic_logit = jnp.dot(pic_ref[...], wpf_ref[...],
                        preferred_element_type=jnp.float32)            # [TB, 1]
    # Word path: relu(cls @ Ww + bw) @ Wo_word  (HID zero-padded to 128).
    word_h = jnp.dot(cls_ref[...], ww_ref[...],
                     preferred_element_type=jnp.float32) + bw_ref[...]  # [TB, 128]
    word_h = jnp.maximum(word_h, 0.0)
    word_logit = jnp.dot(word_h, wow_ref[...],
                         preferred_element_type=jnp.float32)            # [TB, 1]
    logits = pic_logit + word_logit + b_ref[...]
    # sigmoid: exp + approximate reciprocal both run on the EUP slot.
    out_ref[...] = pl.reciprocal(1.0 + jnp.exp(-logits),
                                 approx=True).astype(out_ref.dtype)


def prepare_params(params, compute_dtype=jnp.bfloat16):
    """Fold / pad PyTorch-layout params into the kernel's layout.

    params = (Wp [2048,100], bp [1,100], Ww [768,100], bw [1,100],
              Wo [200,1],    bo [1,1])   -- weights already stored (in, out).
    """
    wp, bp, ww, bw, wo, bo = params
    wo_word = wo[:HID, :]                       # [100, 1]
    wo_pic = wo[HID:, :]                        # [100, 1]

    # Linear-linear fold of the picture branch (mathematically identical).
    wp_folded = (wp @ wo_pic).astype(compute_dtype)          # [2048, 1]
    b_all = (bo + bp @ wo_pic).astype(jnp.float32)           # [1, 1]

    # Zero-pad word path to 128 hidden lanes (relu(0)=0, zero Wo rows -> no-op).
    ww_pad = jnp.zeros((BERT_DIM, HID_PAD), jnp.float32).at[:, :HID].set(ww)
    bw_pad = jnp.zeros((1, HID_PAD), jnp.float32).at[:, :HID].set(bw)
    wo_word_pad = jnp.zeros((HID_PAD, OUT_DIM), jnp.float32).at[:HID, :].set(wo_word)

    return (wp_folded,
            ww_pad.astype(compute_dtype),
            bw_pad,                       # f32 (added to f32 accumulator)
            wo_word_pad,                  # f32 (tiny; dotted with f32 word_h)
            b_all)


def neural_net_forward(picture, word_cls, params, *, block_b=512,
                       compute_dtype=jnp.bfloat16):
    """picture: [B, 2048], word_cls: [B, 768] (BERT CLS embedding)."""
    B = picture.shape[0]
    wpf, ww, bw, wow, b_all = prepare_params(params, compute_dtype)

    # Batch tile: multiple of 8 (sublane) or the whole batch.
    tb = B if B <= block_b else block_b
    b_pad = pl.cdiv(B, tb) * tb

    pic = picture.astype(compute_dtype)
    cls = word_cls.astype(compute_dtype)
    if b_pad != B:
        pic = jnp.pad(pic, ((0, b_pad - B), (0, 0)))
        cls = jnp.pad(cls, ((0, b_pad - B), (0, 0)))

    def batch_spec(shape):
        return pl.BlockSpec((tb, shape[1]), lambda i: (i, 0))

    def const_spec(shape):
        return pl.BlockSpec(shape, lambda i: (0, 0))

    out = pl.pallas_call(
        _fused_head_kernel,
        out_shape=jax.ShapeDtypeStruct((b_pad, OUT_DIM), jnp.float32),
        grid=(b_pad // tb,),
        in_specs=[
            batch_spec(pic.shape),        # picture tile   [tb, 2048]
            batch_spec(cls.shape),        # CLS tile       [tb, 768]
            const_spec(wpf.shape),        # folded pic weight [2048, 1]
            const_spec(ww.shape),         # word weight       [768, 128]
            const_spec(bw.shape),         # word bias         [1, 128]
            const_spec(wow.shape),        # word out weight   [128, 1]
            const_spec(b_all.shape),      # folded bias       [1, 1]
        ],
        out_specs=pl.BlockSpec((tb, OUT_DIM), lambda i: (i, 0)),
        compiler_params=pltpu.CompilerParams(
            dimension_semantics=("parallel",)),
    )(pic, cls, wpf, ww, bw, wow, b_all)

    return out[:B]


def init_params(key):
    ks = jax.random.split(key, 6)
    # Weights stored as (in, out); biases as (1, out).
    wp = jax.random.normal(ks[0], (PIC_DIM, HID), jnp.float32) * 0.02
    bp = jax.random.normal(ks[1], (1, HID), jnp.float32) * 0.02
    ww = jax.random.normal(ks[2], (BERT_DIM, HID), jnp.float32) * 0.02
    bw = jax.random.normal(ks[3], (1, HID), jnp.float32) * 0.02
    wo = jax.random.normal(ks[4], (2 * HID, OUT_DIM), jnp.float32) * 0.02
    bo = jax.random.normal(ks[5], (1, OUT_DIM), jnp.float32) * 0.02
    return wp, bp, ww, bw, wo, bo


def _reference(picture, word_cls, params):
    wp, bp, ww, bw, wo, bo = params
    pic_emb = picture @ wp + bp
    word_emb = jnp.maximum(word_cls @ ww + bw, 0.0)
    h = jnp.concatenate([word_emb, pic_emb], axis=1)
    return jax.nn.sigmoid(h @ wo + bo)


if __name__ == "__main__":
    key = jax.random.PRNGKey(0)
    k_pic, k_word, k_param = jax.random.split(key, 3)

    B = 8
    picture = jax.random.normal(k_pic, (B, PIC_DIM), jnp.float32)
    word_cls = jax.random.normal(k_word, (B, BERT_DIM), jnp.float32)
    params = init_params(k_param)

    out = neural_net_forward(picture, word_cls, params)
    out = jax.block_until_ready(out)

    ref = _reference(picture, word_cls, params)
    assert out.shape == (B, OUT_DIM)
    # bf16 inputs + approx reciprocal: loosened (but still tight) tolerance.
    assert jnp.allclose(out, ref, atol=1e-2, rtol=1e-2), "mismatch vs reference"

    print("KERNEL_OK")
</pallas_src>

<mosaic_0001>
module attributes {stable_mosaic.version = 11 : i64} {
  func.func @_fused_head_kernel(%arg0: i32, %arg1: memref<8x2048xbf16, #tpu.memory_space<vmem>>, %arg2: memref<8x768xbf16, #tpu.memory_space<vmem>>, %arg3: memref<2048x1xbf16, #tpu.memory_space<vmem>>, %arg4: memref<768x128xbf16, #tpu.memory_space<vmem>>, %arg5: memref<1x128xf32, #tpu.memory_space<vmem>>, %arg6: memref<128x1xf32, #tpu.memory_space<vmem>>, %arg7: memref<1x1xf32, #tpu.memory_space<vmem>>, %arg8: memref<8x1xf32, #tpu.memory_space<vmem>>) attributes {dimension_semantics = [#tpu.dimension_semantics<parallel>], iteration_bounds = array<i64: 1>, scalar_prefetch = 0 : i64, scratch_operands = 0 : i64, tpu.core_type = #tpu.core_type<tc>, window_params = [{transform_indices = @transform_0, window_bounds = array<i64: 8, 2048>}, {transform_indices = @transform_1, window_bounds = array<i64: 8, 768>}, {pipeline_mode = #tpu.pipeline_mode<synchronous>, transform_indices = @transform_2, window_bounds = array<i64: 2048, 1>}, {pipeline_mode = #tpu.pipeline_mode<synchronous>, transform_indices = @transform_3, window_bounds = array<i64: 768, 128>}, {pipeline_mode = #tpu.pipeline_mode<synchronous>, transform_indices = @transform_4, window_bounds = array<i64: 1, 128>}, {pipeline_mode = #tpu.pipeline_mode<synchronous>, transform_indices = @transform_5, window_bounds = array<i64: 128, 1>}, {pipeline_mode = #tpu.pipeline_mode<synchronous>, transform_indices = @transform_6, window_bounds = array<i64: 1, 1>}, {transform_indices = @transform_7, window_bounds = array<i64: 8, 1>}]} {
    %c0 = arith.constant 0 : index
    %c0_0 = arith.constant 0 : index
    %0 = vector.load %arg1[%c0, %c0_0] : memref<8x2048xbf16, #tpu.memory_space<vmem>>, vector<8x2048xbf16>
    %c0_1 = arith.constant 0 : index
    %c0_2 = arith.constant 0 : index
    %1 = vector.load %arg3[%c0_1, %c0_2] : memref<2048x1xbf16, #tpu.memory_space<vmem>>, vector<2048x1xbf16>
    %cst = arith.constant dense<0.000000e+00> : vector<8x1xf32>
    %2 = tpu.matmul %0, %1, %cst {dimension_numbers = #tpu.dot_dimension_numbers<[1], [0], [0], [1], [0, 0, 1, 1], [], []>} : vector<8x2048xbf16>, vector<2048x1xbf16>, vector<8x1xf32> -> vector<8x1xf32>
    %c0_3 = arith.constant 0 : index
    %c0_4 = arith.constant 0 : index
    %3 = vector.load %arg2[%c0_3, %c0_4] : memref<8x768xbf16, #tpu.memory_space<vmem>>, vector<8x768xbf16>
    %c0_5 = arith.constant 0 : index
    %c0_6 = arith.constant 0 : index
    %4 = vector.load %arg4[%c0_5, %c0_6] : memref<768x128xbf16, #tpu.memory_space<vmem>>, vector<768x128xbf16>
    %cst_7 = arith.constant dense<0.000000e+00> : vector<8x128xf32>
    %5 = tpu.matmul %3, %4, %cst_7 {dimension_numbers = #tpu.dot_dimension_numbers<[1], [0], [0], [1], [0, 0, 1, 1], [], []>} : vector<8x768xbf16>, vector<768x128xbf16>, vector<8x128xf32> -> vector<8x128xf32>
    %c0_8 = arith.constant 0 : index
    %c0_9 = arith.constant 0 : index
    %6 = vector.load %arg5[%c0_8, %c0_9] : memref<1x128xf32, #tpu.memory_space<vmem>>, vector<1x128xf32>
    %7 = vector.broadcast %6 : vector<1x128xf32> to vector<8x128xf32>
    %8 = arith.addf %5, %7 : vector<8x128xf32>
    %cst_10 = arith.constant 0.000000e+00 : f32
    %9 = vector.broadcast %cst_10 : f32 to vector<8x128xf32>
    %10 = arith.maximumf %8, %9 : vector<8x128xf32>
    %c0_11 = arith.constant 0 : index
    %c0_12 = arith.constant 0 : index
    %11 = vector.load %arg6[%c0_11, %c0_12] : memref<128x1xf32, #tpu.memory_space<vmem>>, vector<128x1xf32>
    %cst_13 = arith.constant dense<0.000000e+00> : vector<8x1xf32>
    %12 = tpu.matmul %10, %11, %cst_13 {dimension_numbers = #tpu.dot_dimension_numbers<[1], [0], [0], [1], [0, 0, 1, 1], [], []>} : vector<8x128xf32>, vector<128x1xf32>, vector<8x1xf32> -> vector<8x1xf32>
    %13 = arith.addf %2, %12 : vector<8x1xf32>
    %c0_14 = arith.constant 0 : index
    %c0_15 = arith.constant 0 : index
    %14 = vector.load %arg7[%c0_14, %c0_15] : memref<1x1xf32, #tpu.memory_space<vmem>>, vector<1x1xf32>
    %15 = vector.broadcast %14 : vector<1x1xf32> to vector<8x1xf32>
    %16 = arith.addf %13, %15 : vector<8x1xf32>
    %cst_16 = arith.constant 0.000000e+00 : f32
    %17 = vector.broadcast %cst_16 : f32 to vector<8x1xf32>
    %18 = arith.subf %17, %16 : vector<8x1xf32>
    %19 = math.exp %18 : vector<8x1xf32>
    %cst_17 = arith.constant 1.000000e+00 : f32
    %20 = vector.broadcast %cst_17 : f32 to vector<8x1xf32>
    %21 = arith.addf %20, %19 : vector<8x1xf32>
    %22 = tpu.reciprocal %21 {approx = true} : vector<8x1xf32> -> vector<8x1xf32>
    %c0_18 = arith.constant 0 : index
    %c0_19 = arith.constant 0 : index
    %23 = vector.load %arg8[%c0_18, %c0_19] : memref<8x1xf32, #tpu.memory_space<vmem>>, vector<8x1xf32>
    tpu.vector_store %arg8[%c0_18, %c0_19], %22 {strides = array<i32>} : memref<8x1xf32, #tpu.memory_space<vmem>>, vector<8x1xf32>,
    return
  }
  func.func @transform_0(%arg0: i32) -> (i32, i32) {
    %c0_i32 = arith.constant 0 : i32
    %c0_i32_0 = arith.constant 0 : i32
    return %arg0, %c0_i32 : i32, i32
  }
  func.func @transform_1(%arg0: i32) -> (i32, i32) {
    %c0_i32 = arith.constant 0 : i32
    %c0_i32_0 = arith.constant 0 : i32
    return %arg0, %c0_i32 : i32, i32
  }
  func.func @transform_2(%arg0: i32) -> (i32, i32) {
    %c0_i32 = arith.constant 0 : i32
    %c0_i32_0 = arith.constant 0 : i32
    %c0_i32_1 = arith.constant 0 : i32
    return %c0_i32, %c0_i32_0 : i32, i32
  }
  func.func @transform_3(%arg0: i32) -> (i32, i32) {
    %c0_i32 = arith.constant 0 : i32
    %c0_i32_0 = arith.constant 0 : i32
    %c0_i32_1 = arith.constant 0 : i32
    return %c0_i32, %c0_i32_0 : i32, i32
  }
  func.func @transform_4(%arg0: i32) -> (i32, i32) {
    %c0_i32 = arith.constant 0 : i32
    %c0_i32_0 = arith.constant 0 : i32
    %c0_i32_1 = arith.constant 0 : i32
    return %c0_i32, %c0_i32_0 : i32, i32
  }
  func.func @transform_5(%arg0: i32) -> (i32, i32) {
    %c0_i32 = arith.constant 0 : i32
    %c0_i32_0 = arith.constant 0 : i32
    %c0_i32_1 = arith.constant 0 : i32
    return %c0_i32, %c0_i32_0 : i32, i32
  }
  func.func @transform_6(%arg0: i32) -> (i32, i32) {
    %c0_i32 = arith.constant 0 : i32
    %c0_i32_0 = arith.constant 0 : i32
    %c0_i32_1 = arith.constant 0 : i32
    return %c0_i32, %c0_i32_0 : i32, i32
  }
  func.func @transform_7(%arg0: i32) -> (i32, i32) {
    %c0_i32 = arith.constant 0 : i32
    %c0_i32_0 = arith.constant 0 : i32
    return %arg0, %c0_i32 : i32, i32
  }
}

</mosaic_0001>

<bundles_post_ra>
// kernel: tpu_custom_call.1
= control target key start
LH: loop header
LB: loop body
LE: loop exit
PB: predicated region body
PF: predicated region fallthrough
CT: control target
= control target key end

     0   :  { %vm1861_vm0 = vcmask 7168   ;;  %s3423_s3 = inlined_call_operand.vmem [shape: bf16[768,128], index: 3, kind: input, shape index: {}]   ;;  %s3424_s4 = inlined_call_operand.vmem [shape: f32[1,128], index: 4, kind: input, shape index: {}]   ;;  %s3425_s1 = inlined_call_operand.vmem [shape: bf16[8,768], index: 1, kind: input, shape index: {}]   ;;  %s3426_s5 = inlined_call_operand.vmem [shape: f32[128,1], index: 5, kind: input, shape index: {}]   ;;  %s3427_s2 = inlined_call_operand.vmem [shape: bf16[2048,1], index: 2, kind: input, shape index: {}]   ;;  %s3428_s0 = inlined_call_operand.vmem [shape: bf16[8,2048], index: 0, kind: input, shape index: {}]   ;;  %s3429_s6 = inlined_call_operand.<no memory space> [shape: f32[1,1], index: 6, kind: input, shape index: {}]   ;;  %s3430_s7 = inlined_call_operand.vmem [shape: f32[8,1], index: 7, kind: output, shape index: {}]  }
   0x1   :  { %v2706_v0 = vld [vmem:[%s3423_s3 + $0x38] sm:$0xff]  ;;  %v2705_v2 = vld [vmem:[%s3423_s3 + $0x30] sm:$0xff]  ;;  %v2704_v8 = vld [vmem:[%s3423_s3 + $0x28] sm:$0xff] }
   0x2   :  { %v2714_v1 = vld [vmem:[%s3423_s3 + $0x78] sm:$0xff]  ;;  %704 = vmatpush.bf16.msra.mxu0 %v2706_v0  ;;  %v2713_v3 = vld [vmem:[%s3423_s3 + $0x70] sm:$0xff]  ;;  %v2712_v9 = vld [vmem:[%s3423_s3 + $0x68] sm:$0xff] }
   0x3   :  { %717 = vmatpush.bf16.msra.mxu1 %v2714_v1  ;;  %v2722_v4 = vld [vmem:[%s3423_s3 + $0xb8] sm:$0xff]  ;;  %v2721_v6 = vld [vmem:[%s3423_s3 + $0xb0] sm:$0xff]  ;;  %v2720_v10 = vld [vmem:[%s3423_s3 + $0xa8] sm:$0xff] }
   0x4   :  { %v2730_v5 = vld [vmem:[%s3423_s3 + $0xf8] sm:$0xff]  ;;  %730 = vmatpush.bf16.msra.mxu2 %v2722_v4  ;;  %v2729_v7 = vld [vmem:[%s3423_s3 + $0xf0] sm:$0xff]  ;;  %v2728_v11 = vld [vmem:[%s3423_s3 + $0xe8] sm:$0xff] }
   0x5   :  { %743 = vmatpush.bf16.msra.mxu3 %v2730_v5  ;;  %v2703_v12 = vld [vmem:[%s3423_s3 + $0x20] sm:$0xff]  ;;  %v2702_v16 = vld [vmem:[%s3423_s3 + $0x18] sm:$0xff]  ;;  %v2701_v20 = vld [vmem:[%s3423_s3 + $0x10] sm:$0xff] }
   0x6   :  { %705 = vmatpush.bf16.msra.mxu0 %v2705_v2  ;;  %v2711_v13 = vld [vmem:[%s3423_s3 + $0x60] sm:$0xff]  ;;  %v2710_v17 = vld [vmem:[%s3423_s3 + $0x58] sm:$0xff]  ;;  %v2709_v21 = vld [vmem:[%s3423_s3 + $0x50] sm:$0xff] }
   0x7   :  { %718 = vmatpush.bf16.msra.mxu1 %v2713_v3  ;;  %v2719_v14 = vld [vmem:[%s3423_s3 + $0xa0] sm:$0xff]  ;;  %v2718_v18 = vld [vmem:[%s3423_s3 + $0x98] sm:$0xff]  ;;  %v2717_v22 = vld [vmem:[%s3423_s3 + $0x90] sm:$0xff] }
   0x8   :  { %731 = vmatpush.bf16.msra.mxu2 %v2721_v6  ;;  %v2727_v15 = vld [vmem:[%s3423_s3 + $0xe0] sm:$0xff]  ;;  %v2726_v19 = vld [vmem:[%s3423_s3 + $0xd8] sm:$0xff]  ;;  %v2725_v23 = vld [vmem:[%s3423_s3 + $0xd0] sm:$0xff] }
   0x9   :  { %744 = vmatpush.bf16.msra.mxu3 %v2729_v7  ;;  %v2700_v24 = vld [vmem:[%s3423_s3 + $0x8] sm:$0xff]  ;;  %v292_v26 = vld [vmem:[%s3425_s1] sm:$0xff]  ;;  %v2738_v34 = vld [vmem:[%s3423_s3 + $0x138] sm:$0xff] }
   0xa   :  { %706 = vmatpush.bf16.msra.mxu0 %v2704_v8  ;;  %v2708_v25 = vld [vmem:[%s3423_s3 + $0x48] sm:$0xff]  ;;  %v398_v28 = vunpack.c.l.b16 %v292_v26  ;;  %v399_v30 = vunpack.c.h.b16 %v292_v26  ;;  %v2699_v32 = vld [vmem:[%s3423_s3] sm:$0xff]  ;;  %v2746_v35 = vld [vmem:[%s3423_s3 + $0x178] sm:$0xff] }
   0xb   :  { %719 = vmatpush.bf16.msra.mxu1 %v2712_v9  ;;  %v2716_v27 = vld [vmem:[%s3423_s3 + $0x88] sm:$0xff]  ;;  %v2707_v33 = vld [vmem:[%s3423_s3 + $0x40] sm:$0xff]  ;;  %v2737_v42 = vld [vmem:[%s3423_s3 + $0x130] sm:$0xff] }
   0xc   :  { %732 = vmatpush.bf16.msra.mxu2 %v2720_v10  ;;  %v2724_v29 = vld [vmem:[%s3423_s3 + $0xc8] sm:$0xff]  ;;  %v2715_v36 = vld [vmem:[%s3423_s3 + $0x80] sm:$0xff]  ;;  %v404_v38 = vpack.c.b16 %v398_v28, %v398_v28  ;;  %v405_v39 = vpack.c.b16 %v399_v30, %v399_v30  ;;  %v2745_v43 = vld [vmem:[%s3423_s3 + $0x170] sm:$0xff] }
   0xd   :  { %745 = vmatpush.bf16.msra.mxu3 %v2728_v11  ;;  %v293_v31 = vld [vmem:[%s3425_s1 + $0x8] sm:$0xff]  ;;  %v2723_v41 = vld [vmem:[%s3423_s3 + $0xc0] sm:$0xff]  ;;  %v798_v44 = vld [vmem:[%s3426_s5 + $0x78] sm:$0xff] }
   0xe   :  { %707 = vmatpush.bf16.msra.mxu0 %v2703_v12  ;;  %v400_v37 = vunpack.c.l.b16 %v293_v31  ;;  %v401_v40 = vunpack.c.h.b16 %v293_v31  ;;  %v2578_v46 = vld [vmem:[%s3427_s2 + $0x38] sm:$0xff]  ;;  %v797_v48 = vld [vmem:[%s3426_s5 + $0x70] sm:$0xff]  ;;  %v2736_v49 = vld [vmem:[%s3423_s3 + $0x128] sm:$0xff] }
   0xf   :  { %720 = vmatpush.bf16.msra.mxu1 %v2711_v13  ;;  %v2744_v50 = vld [vmem:[%s3423_s3 + $0x168] sm:$0xff]  ;;  %v2577_v51 = vld [vmem:[%s3427_s2 + $0x30] sm:$0xff]  ;;  %v2735_v53 = vld [vmem:[%s3423_s3 + $0x120] sm:$0xff] }
  0x10   :  { %733 = vmatpush.bf16.msra.mxu2 %v2719_v14  ;;  %v406_v45 = vpack.c.b16 %v400_v37, %v400_v37  ;;  %v407_v47 = vpack.c.b16 %v401_v40, %v401_v40  ;;  %v796_v52 = vld [vmem:[%s3426_s5 + $0x68] sm:$0xff]  ;;  %v2743_v54 = vld [vmem:[%s3423_s3 + $0x160] sm:$0xff]  ;;  %v794_v57 = vld [vmem:[%s3426_s5 + $0x58] sm:$0xff] }
  0x11   :  { %746 = vmatpush.bf16.msra.mxu3 %v2727_v15  ;;  %v795_v55 = vld [vmem:[%s3426_s5 + $0x60] sm:$0xff]  ;;  %v2576_v56 = vld [vmem:[%s3427_s2 + $0x28] sm:$0xff]  ;;  %v2734_v58 = vld [vmem:[%s3423_s3 + $0x118] sm:$0xff] }
  0x12   :  { %708 = vmatpush.bf16.msra.mxu0 %v2702_v16  ;;  %v2742_v59 = vld [vmem:[%s3423_s3 + $0x158] sm:$0xff]  ;;  %v793_v60 = vld [vmem:[%s3426_s5 + $0x50] sm:$0xff]  ;;  %v2575_v61 = vld [vmem:[%s3427_s2 + $0x20] sm:$0xff] }
  0x13   :  { %721 = vmatpush.bf16.msra.mxu1 %v2710_v17  ;;  %v792_v62 = vld [vmem:[%s3426_s5 + $0x48] sm:$0xff]  ;;  %v2733_v63 = vld [vmem:[%s3423_s3 + $0x110] sm:$0xff]  ;;  %v791_v1 = vld [vmem:[%s3426_s5 + $0x40] sm:$0xff] }
  0x14   :  { %734 = vmatpush.bf16.msra.mxu2 %v2718_v18  ;;  %v2741_v0 = vld [vmem:[%s3423_s3 + $0x150] sm:$0xff]  ;;  %v2574_v2 = vld [vmem:[%s3427_s2 + $0x18] sm:$0xff]  ;;  %v2732_v4 = vld [vmem:[%s3423_s3 + $0x108] sm:$0xff] }
  0x15   :  { %747 = vmatpush.bf16.msra.mxu3 %v2726_v19  ;;  %v790_v3 = vld [vmem:[%s3426_s5 + $0x38] sm:$0xff]  ;;  %v2740_v5 = vld [vmem:[%s3423_s3 + $0x148] sm:$0xff]  ;;  %v294_v6 = vld [vmem:[%s3425_s1 + $0x10] sm:$0xff] }
  0x16   :  { %709 = vmatpush.bf16.msra.mxu0 %v2701_v20  ;;  %v789_v7 = vld [vmem:[%s3426_s5 + $0x30] sm:$0xff]  ;;  %v788_v9 = vld [vmem:[%s3426_s5 + $0x28] sm:$0xff]  ;;  %v402_v10 = vunpack.c.l.b16 %v294_v6  ;;  %v403_v11 = vunpack.c.h.b16 %v294_v6  ;;  %v2731_v12 = vld [vmem:[%s3423_s3 + $0x100] sm:$0xff] }
  0x17   :  { %722 = vmatpush.bf16.msra.mxu1 %v2709_v21  ;;  %v2573_v8 = vld [vmem:[%s3427_s2 + $0x10] sm:$0xff]  ;;  %v2739_v13 = vld [vmem:[%s3423_s3 + $0x140] sm:$0xff]  ;;  %v2586_v15 = vld [vmem:[%s3427_s2 + $0x78] sm:$0xff] }
  0x18   :  { %735 = vmatpush.bf16.msra.mxu2 %v2717_v22  ;;  %v787_v14 = vld [vmem:[%s3426_s5 + $0x20] sm:$0xff]  ;;  %v2594_v16 = vld [vmem:[%s3427_s2 + $0xb8] sm:$0xff]  ;;  %v2572_v17 = vld [vmem:[%s3427_s2 + $0x8] sm:$0xff]  ;;  %v408_v18 = vpack.c.b16 %v402_v10, %v402_v10  ;;  %v409_v19 = vpack.c.b16 %v403_v11, %v403_v11 }
  0x19   :  { %748 = vmatpush.bf16.msra.mxu3 %v2725_v23  ;;  %v786_v20 = vld [vmem:[%s3426_s5 + $0x18] sm:$0xff]  ;;  %v2585_v21 = vld [vmem:[%s3427_s2 + $0x70] sm:$0xff]  ;;  %v2592_v26 = vld [vmem:[%s3427_s2 + $0xa8] sm:$0xff] }
  0x1a   :  { %710 = vmatpush.bf16.msra.mxu0 %v2700_v24  ;;  %v2593_v22 = vld [vmem:[%s3427_s2 + $0xb0] sm:$0xff]  ;;  %v784_v24 = vld [vmem:[%s3426_s5 + $0x8] sm:$0xff]  ;;  %v2591_v28 = vld [vmem:[%s3427_s2 + $0xa0] sm:$0xff] }
  0x1b   :  { %723 = vmatpush.bf16.msra.mxu1 %v2708_v25  ;;  %v785_v23 = vld [vmem:[%s3426_s5 + $0x10] sm:$0xff]  ;;  %v2584_v25 = vld [vmem:[%s3427_s2 + $0x68] sm:$0xff]  ;;  %v783_v30 = vld [vmem:[%s3426_s5] sm:$0xff] }
  0x1c   :  { %736 = vmatpush.bf16.msra.mxu2 %v2716_v27  ;;  %v2583_v27 = vld [vmem:[%s3427_s2 + $0x60] sm:$0xff]  ;;  %v2590_v31 = vld [vmem:[%s3427_s2 + $0x98] sm:$0xff]  ;;  %v2601_v37 = vld [vmem:[%s3427_s2 + $0xf0] sm:$0xff] }
  0x1d   :  { %749 = vmatpush.bf16.msra.mxu3 %v2724_v29  ;;  %v2582_v29 = vld [vmem:[%s3427_s2 + $0x58] sm:$0xff]  ;;  %v2588_v40 = vld [vmem:[%s3427_s2 + $0x88] sm:$0xff]  ;;  %v2621_v11 = vld [vmem:[%s3427_s2 + $0x190] sm:$0xff] }
  0x1e   :  { %711 = vmatpush.bf16.msra.mxu0 %v2699_v32  ;;  %v2602_v32 = vld [vmem:[%s3427_s2 + $0xf8] sm:$0xff] }
  0x1f   :  { %724 = vmatpush.bf16.msra.mxu1 %v2707_v33  ;;  %v2571_v33 = vld [vmem:[%s3427_s2] sm:$0xff]  ;;  %v2642_v10 = vld [vmem:[%s3427_s2 + $0x238] sm:$0xff] }
  0x20   :  { %737 = vmatpush.bf16.msra.mxu2 %v2715_v36  ;;  %v2589_v36 = vld [vmem:[%s3427_s2 + $0x90] sm:$0xff] }
  0x21   :  { %712 = vmatmul.bf16.vlgmr.msra.gmra.mxu0 %v404_v38  ;;  %750 = vmatpush.bf16.msra.mxu3 %v2723_v41  ;;  %v2580_v38 = vld [vmem:[%s3427_s2 + $0x48] sm:$0xff] }
  0x22   :  { %756 = vmatpush.bf16.msrb.mxu0 %v2738_v34  ;;  %725 = vmatmul.bf16.vlgmr.msra.gmra.mxu1 %v405_v39  ;;  %v2581_v34 = vld [vmem:[%s3427_s2 + $0x50] sm:$0xff]  ;;  %v2600_v41 = vld [vmem:[%s3427_s2 + $0xe8] sm:$0xff] }
  0x23   :  { %769 = vmatpush.bf16.msrb.mxu1 %v2746_v35  ;;  %738 = vmatmul.bf16.vlgmr.msra.gmra.mxu2 %v406_v45  ;;  %v2610_v35 = vld [vmem:[%s3427_s2 + $0x138] sm:$0xff]  ;;  %v2609_v39 = vld [vmem:[%s3427_s2 + $0x130] sm:$0xff]  ;;  %v2587_v45 = vld [vmem:[%s3427_s2 + $0x80] sm:$0xff] }
  0x24   :  { %799 = vmatpush.msrb.mxu2 %v798_v44  ;;  %751 = vmatmul.bf16.vlgmr.msra.gmra.mxu3 %v407_v47  ;;  %v2618_v44 = vld [vmem:[%s3427_s2 + $0x178] sm:$0xff]  ;;  %v2599_v47 = vld [vmem:[%s3427_s2 + $0xe0] sm:$0xff] }
  0x25   :  { %1643 = vmatpush.bf16.msrb.mxu3 %v2578_v46  ;;  %v2626_v46 = vld [vmem:[%s3427_s2 + $0x1b8] sm:$0xff] }
  0x26   :  { %757 = vmatpush.bf16.msrb.mxu0 %v2737_v42  ;;  %800 = vmatpush.msrb.mxu2 %v797_v48  ;;  %v2579_v42 = vld [vmem:[%s3427_s2 + $0x40] sm:$0xff] }
  0x27   :  { %770 = vmatpush.bf16.msrb.mxu1 %v2745_v43  ;;  %v2608_v43 = vld [vmem:[%s3427_s2 + $0x128] sm:$0xff]  ;;  %v2607_v48 = vld [vmem:[%s3427_s2 + $0x120] sm:$0xff] }
  0x28   :  { %801 = vmatpush.msrb.mxu2 %v796_v52  ;;  %v2606_v52 = vld [vmem:[%s3427_s2 + $0x118] sm:$0xff] }
  0x29   :  { %1644 = vmatpush.bf16.msrb.mxu3 %v2577_v51  ;;  %v2598_v51 = vld [vmem:[%s3427_s2 + $0xd8] sm:$0xff] }
  0x2a   :  { %758 = vmatpush.bf16.msrb.mxu0 %v2736_v49  ;;  %802 = vmatpush.msrb.mxu2 %v795_v55  ;;  %v2617_v49 = vld [vmem:[%s3427_s2 + $0x170] sm:$0xff] }
  0x2b   :  { %771 = vmatpush.bf16.msrb.mxu1 %v2744_v50  ;;  %v2625_v50 = vld [vmem:[%s3427_s2 + $0x1b0] sm:$0xff] }
  0x2c   :  { %803 = vmatpush.msrb.mxu2 %v794_v57  ;;  %v2597_v55 = vld [vmem:[%s3427_s2 + $0xd0] sm:$0xff] }
  0x2d   :  { %1645 = vmatpush.bf16.msrb.mxu3 %v2576_v56  ;;  %v28_v56 = vld [vmem:[%s3428_s0] sm:$0xff] }
  0x2e   :  { %759 = vmatpush.bf16.msrb.mxu0 %v2735_v53  ;;  %804 = vmatpush.msrb.mxu2 %v793_v60  ;;  %v2616_v53 = vld [vmem:[%s3427_s2 + $0x168] sm:$0xff]  ;;  %v827_v57 = vunpack.c.l.b16 %v28_v56 }
  0x2f   :  { %772 = vmatpush.bf16.msrb.mxu1 %v2743_v54  ;;  %v2624_v54 = vld [vmem:[%s3427_s2 + $0x1a8] sm:$0xff] }
  0x30   :  { %805 = vmatpush.msrb.mxu2 %v792_v62  ;;  %v843_v60 = vpack.c.b16 %v827_v57, %v827_v57  ;;  %v2623_v62 = vld [vmem:[%s3427_s2 + $0x1a0] sm:$0xff]  ;;  %v2634_v57 = vld [vmem:[%s3427_s2 + $0x1f8] sm:$0xff] }
  0x31   :  { %1646 = vmatpush.bf16.msrb.mxu3 %v2575_v61  ;;  %v2596_v61 = vld [vmem:[%s3427_s2 + $0xc8] sm:$0xff] }
  0x32   :  { %760 = vmatpush.bf16.msrb.mxu0 %v2734_v58  ;;  %806 = vmatpush.msrb.mxu2 %v791_v1  ;;  %v2605_v58 = vld [vmem:[%s3427_s2 + $0x110] sm:$0xff] }
  0x33   :  { %773 = vmatpush.bf16.msrb.mxu1 %v2742_v59  ;;  %v2615_v59 = vld [vmem:[%s3427_s2 + $0x160] sm:$0xff] }
  0x34   :  { %807 = vmatpush.msrb.mxu2 %v790_v3  ;;  %v2595_v3 = vld [vmem:[%s3427_s2 + $0xc0] sm:$0xff] }
  0x35   :  { %1647 = vmatpush.bf16.msrb.mxu3 %v2574_v2 }
  0x36   :  { %761 = vmatpush.bf16.msrb.mxu0 %v2733_v63  ;;  %808 = vmatpush.msrb.mxu2 %v789_v7  ;;  %v2604_v63 = vld [vmem:[%s3427_s2 + $0x108] sm:$0xff]  ;;  %v2603_v7 = vld [vmem:[%s3427_s2 + $0x100] sm:$0xff] }
  0x37   :  { %774 = vmatpush.bf16.msrb.mxu1 %v2741_v0  ;;  %v2614_v0 = vld [vmem:[%s3427_s2 + $0x158] sm:$0xff] }
  0x38   :  { %809 = vmatpush.msrb.mxu2 %v788_v9  ;;  %v3153_v9 = vld [vmem:[%s3428_s0 + $0x8] sm:$0xff] }
  0x39   :  { %1648 = vmatpush.bf16.msrb.mxu3 %v2573_v8  ;;  %v2613_v8 = vld [vmem:[%s3427_s2 + $0x150] sm:$0xff] }
  0x3a   :  { %762 = vmatpush.bf16.msrb.mxu0 %v2732_v4  ;;  %810 = vmatpush.msrb.mxu2 %v787_v14  ;;  %v2622_v4 = vld [vmem:[%s3427_s2 + $0x198] sm:$0xff] }
  0x3b   :  { %775 = vmatpush.bf16.msrb.mxu1 %v2740_v5  ;;  %v828_v5 = vunpack.c.h.b16 %v28_v56 }
  0x3c   :  { %811 = vmatpush.msrb.mxu2 %v786_v20 }
  0x3d   :  { %1649 = vmatpush.bf16.msrb.mxu3 %v2572_v17  ;;  %v844_v6 = vpack.c.b16 %v828_v5, %v828_v5  ;;  %v2633_v5 = vld [vmem:[%s3427_s2 + $0x1f0] sm:$0xff] }
  0x3e   :  { %763 = vmatpush.bf16.msrb.mxu0 %v2731_v12  ;;  %812 = vmatpush.msrb.mxu2 %v785_v23  ;;  %v829_v12 = vunpack.c.l.b16 %v3153_v9  ;;  %v2747_v23 = vld [vmem:[%s3424_s4] ss:$0 sm:$0xff] }
  0x3f   :  { %776 = vmatpush.bf16.msrb.mxu1 %v2739_v13 }
  0x40   :  { %813 = vmatpush.msrb.mxu2 %v784_v24  ;;  %v845_v13 = vpack.c.b16 %v829_v12, %v829_v12  ;;  %v2611_v24 = vld [vmem:[%s3427_s2 + $0x140] sm:$0xff]  ;;  %v2672_v12 = vld [vmem:[%s3427_s2 + $0x328] sm:$0xff] }
  0x41   :  { %764 = vmatmul.bf16.vlgmr.msrb.gmra.mxu0 %v408_v18  ;;  %1650 = vmatpush.bf16.msrb.mxu3 %v2571_v33  ;;  %v2641_v18 = vld [vmem:[%s3427_s2 + $0x230] sm:$0xff] }
  0x42   :  { %1656 = vmatpush.bf16.msra.mxu0 %v2586_v15  ;;  %777 = vmatmul.bf16.vlgmr.msrb.gmra.mxu1 %v409_v19  ;;  %v2620_v19 = vld [vmem:[%s3427_s2 + $0x188] sm:$0xff]  ;;  %v2649_v33 = vld [vmem:[%s3427_s2 + $0x270] sm:$0xff] }
  0x43   :  { %1669 = vmatpush.bf16.msra.mxu1 %v2594_v16  ;;  %814 = vmatpush.msrb.mxu2 %v783_v30  ;;  %v2612_v16 = vld [vmem:[%s3427_s2 + $0x148] sm:$0xff] }
  0x44   :  { %1651 = vmatmul.bf16.vlgmr.msrb.gmra.mxu3 %v843_v60  ;;  %v32_v60 = vld [vmem:[%s3428_s0 + $0x20] sm:$0xff] }
  0x45   :  { %1682 = vmatpush.bf16.msra.mxu2 %v2602_v32  ;;  %1695 = vmatpush.bf16.msra.mxu3 %v2610_v35  ;;  %v2639_v32 = vld [vmem:[%s3427_s2 + $0x220] sm:$0xff]  ;;  %v2657_v35 = vld [vmem:[%s3427_s2 + $0x2b0] sm:$0xff] }
  0x46   :  { %1657 = vmatpush.bf16.msra.mxu0 %v2585_v21  ;;  %v30_v21 = vld [vmem:[%s3428_s0 + $0x10] sm:$0xff] }
  0x47   :  { %1670 = vmatpush.bf16.msra.mxu1 %v2593_v22  ;;  %v831_v22 = vunpack.c.l.b16 %v30_v21 }
  0x49   :  { %1683 = vmatpush.bf16.msra.mxu2 %v2601_v37  ;;  %1696 = vmatpush.bf16.msra.mxu3 %v2609_v39 }
  0x4a   :  { %1658 = vmatpush.bf16.msra.mxu0 %v2584_v25  ;;  %v847_v25 = vpack.c.b16 %v831_v22, %v831_v22  ;;  %v2671_v22 = vld [vmem:[%s3427_s2 + $0x320] sm:$0xff] }
  0x4b   :  { %1671 = vmatpush.bf16.msra.mxu1 %v2592_v26  ;;  %v2640_v26 = vld [vmem:[%s3427_s2 + $0x228] sm:$0xff] }
  0x4d   :  { %1684 = vmatpush.bf16.msra.mxu2 %v2600_v41  ;;  %1697 = vmatpush.bf16.msra.mxu3 %v2608_v43  ;;  %v2648_v41 = vld [vmem:[%s3427_s2 + $0x268] sm:$0xff] }
  0x4e   :  { %1659 = vmatpush.bf16.msra.mxu0 %v2583_v27  ;;  %v2650_v27 = vld [vmem:[%s3427_s2 + $0x278] sm:$0xff] }
  0x4f   :  { %1672 = vmatpush.bf16.msra.mxu1 %v2591_v28  ;;  %v2619_v28 = vld [vmem:[%s3427_s2 + $0x180] sm:$0xff] }
  0x51   :  { %1685 = vmatpush.bf16.msra.mxu2 %v2599_v47  ;;  %1698 = vmatpush.bf16.msra.mxu3 %v2607_v48  ;;  %v2647_v47 = vld [vmem:[%s3427_s2 + $0x260] sm:$0xff] }
  0x52   :  { %1660 = vmatpush.bf16.msra.mxu0 %v2582_v29  ;;  %v2658_v29 = vld [vmem:[%s3427_s2 + $0x2b8] sm:$0xff]  ;;  %v2655_v48 = vld [vmem:[%s3427_s2 + $0x2a0] sm:$0xff] }
  0x53   :  { %1673 = vmatpush.bf16.msra.mxu1 %v2590_v31 }
  0x55   :  { %1686 = vmatpush.bf16.msra.mxu2 %v2598_v51  ;;  %1699 = vmatpush.bf16.msra.mxu3 %v2606_v52  ;;  %v2636_v52 = vld [vmem:[%s3427_s2 + $0x208] sm:$0xff] }
  0x56   :  { %1661 = vmatpush.bf16.msra.mxu0 %v2581_v34 }
  0x57   :  { %1674 = vmatpush.bf16.msra.mxu1 %v2589_v36  ;;  %v832_v36 = vunpack.c.h.b16 %v30_v21 }
  0x59   :  { %1687 = vmatpush.bf16.msra.mxu2 %v2597_v55  ;;  %1700 = vmatpush.bf16.msra.mxu3 %v2605_v58  ;;  %v848_v39 = vpack.c.b16 %v832_v36, %v832_v36  ;;  %v2654_v55 = vld [vmem:[%s3427_s2 + $0x298] sm:$0xff]  ;;  %v2635_v58 = vld [vmem:[%s3427_s2 + $0x200] sm:$0xff] }
  0x5a   :  { %1662 = vmatpush.bf16.msra.mxu0 %v2580_v38  ;;  %v3204_v38 = vld [vmem:[%s3428_s0 + $0x18] sm:$0xff] }
  0x5b   :  { %1675 = vmatpush.bf16.msra.mxu1 %v2588_v40  ;;  %v2638_v40 = vld [vmem:[%s3427_s2 + $0x218] sm:$0xff]  ;;  %v834_v36 = vunpack.c.h.b16 %v3204_v38 }
  0x5d   :  { %1688 = vmatpush.bf16.msra.mxu2 %v2596_v61  ;;  %1701 = vmatpush.bf16.msra.mxu3 %v2604_v63  ;;  %v835_v63 = vunpack.c.l.b16 %v32_v60 }
  0x5e   :  { %1663 = vmatpush.bf16.msra.mxu0 %v2579_v42  ;;  %v833_v42 = vunpack.c.l.b16 %v3204_v38  ;;  %v34_v38 = vld [vmem:[%s3428_s0 + $0x30] sm:$0xff] }
  0x5f   :  { %1676 = vmatpush.bf16.msra.mxu1 %v2587_v45 }
  0x60   :  { %v849_v43 = vpack.c.b16 %v833_v42, %v833_v42  ;;  %v2677_v42 = vld [vmem:[%s3427_s2 + $0x350] sm:$0xff] }
  0x61   :  { %1689 = vmatpush.bf16.msra.mxu2 %v2595_v3  ;;  %1702 = vmatpush.bf16.msra.mxu3 %v2603_v7  ;;  %v2673_v7 = vld [vmem:[%s3427_s2 + $0x330] sm:$0xff] }
  0x62   :  { %1708 = vmatpush.bf16.msrb.mxu0 %v2618_v44  ;;  %1677 = vmatmul.bf16.vlgmr.msra.gmra.mxu1 %v845_v13  ;;  %v2656_v44 = vld [vmem:[%s3427_s2 + $0x2a8] sm:$0xff]  ;;  %v2682_v13 = vld [vmem:[%s3427_s2 + $0x378] sm:$0xff] }
  0x63   :  { %1721 = vmatpush.bf16.msrb.mxu1 %v2626_v46  ;;  %1664 = vmatmul.bf16.vlgmr.msra.gmra.mxu0 %v844_v6  ;;  %v2637_v46 = vld [vmem:[%s3427_s2 + $0x210] sm:$0xff]  ;;  %v2644_v6 = vld [vmem:[%s3427_s2 + $0x248] sm:$0xff] }
  0x64   :  { %1703 = vmatmul.bf16.vlgmr.msra.gmra.mxu3 %v847_v25  ;;  %v2630_v25 = vld [vmem:[%s3427_s2 + $0x1d8] sm:$0xff] }
  0x65   :  { %1747 = vmatpush.bf16.msrb.mxu3 %v2642_v10  ;;  %v2632_v10 = vld [vmem:[%s3427_s2 + $0x1e8] sm:$0xff] }
  0x66   :  { %1709 = vmatpush.bf16.msrb.mxu0 %v2617_v49 }
  0x67   :  { %1722 = vmatpush.bf16.msrb.mxu1 %v2625_v50 }
  0x69   :  { %1748 = vmatpush.bf16.msrb.mxu3 %v2641_v18  ;;  %v2690_v18 = vld [vmem:[%s3427_s2 + $0x3b8] sm:$0xff] }
  0x6a   :  { %1710 = vmatpush.bf16.msrb.mxu0 %v2616_v53  ;;  %v2646_v53 = vld [vmem:[%s3427_s2 + $0x258] sm:$0xff] }
  0x6b   :  { %1723 = vmatpush.bf16.msrb.mxu1 %v2624_v54 }
  0x6d   :  { %1749 = vmatpush.bf16.msrb.mxu3 %v2640_v26  ;;  %v2670_v26 = vld [vmem:[%s3427_s2 + $0x318] sm:$0xff] }
  0x6e   :  { %1711 = vmatpush.bf16.msrb.mxu0 %v2615_v59  ;;  %v2645_v59 = vld [vmem:[%s3427_s2 + $0x250] sm:$0xff] }
  0x6f   :  { %1724 = vmatpush.bf16.msrb.mxu1 %v2623_v62  ;;  %v2674_v62 = vld [vmem:[%s3427_s2 + $0x338] sm:$0xff] }
  0x71   :  { %1750 = vmatpush.bf16.msrb.mxu3 %v2639_v32  ;;  %v2687_v32 = vld [vmem:[%s3427_s2 + $0x3a0] sm:$0xff] }
  0x72   :  { %1712 = vmatpush.bf16.msrb.mxu0 %v2614_v0  ;;  %v2653_v0 = vld [vmem:[%s3427_s2 + $0x290] sm:$0xff] }
  0x73   :  { %1725 = vmatpush.bf16.msrb.mxu1 %v2622_v4 }
  0x75   :  { %1751 = vmatpush.bf16.msrb.mxu3 %v2638_v40  ;;  %v2666_v40 = vld [vmem:[%s3427_s2 + $0x2f8] sm:$0xff] }
  0x76   :  { %1713 = vmatpush.bf16.msrb.mxu0 %v2613_v8  ;;  %v2652_v8 = vld [vmem:[%s3427_s2 + $0x288] sm:$0xff] }
  0x77   :  { %1726 = vmatpush.bf16.msrb.mxu1 %v2621_v11  ;;  %v2643_v11 = vld [vmem:[%s3427_s2 + $0x240] sm:$0xff] }
  0x79   :  { %1752 = vmatpush.bf16.msrb.mxu3 %v2637_v46 }
  0x7a   :  { %1714 = vmatpush.bf16.msrb.mxu0 %v2612_v16  ;;  %v3283_v16 = vld [vmem:[%s3428_s0 + $0x28] sm:$0xff] }
  0x7b   :  { %1727 = vmatpush.bf16.msrb.mxu1 %v2620_v19  ;;  %v837_v19 = vunpack.c.l.b16 %v3283_v16 }
  0x7d   :  { %1753 = vmatpush.bf16.msrb.mxu3 %v2636_v52  ;;  %v853_v21 = vpack.c.b16 %v837_v19, %v837_v19  ;;  %v840_v52 = vunpack.c.h.b16 %v34_v38 }
  0x7e   :  { %1715 = vmatpush.bf16.msrb.mxu0 %v2611_v24  ;;  %v2689_v24 = vld [vmem:[%s3427_s2 + $0x3b0] sm:$0xff] }
  0x7f   :  { %1728 = vmatpush.bf16.msrb.mxu1 %v2619_v28  ;;  %v2688_v28 = vld [vmem:[%s3427_s2 + $0x3a8] sm:$0xff] }
  0x81   :  { %1716 = vmatmul.bf16.vlgmr.msrb.gmra.mxu0 %v848_v39  ;;  %1754 = vmatpush.bf16.msrb.mxu3 %v2635_v58  ;;  %v2627_v39 = vld [vmem:[%s3427_s2 + $0x1c0] sm:$0xff] }
  0x82   :  { %1760 = vmatpush.bf16.msra.mxu0 %v2650_v27  ;;  %1729 = vmatmul.bf16.vlgmr.msrb.gmra.mxu1 %v849_v43  ;;  %v2680_v27 = vld [vmem:[%s3427_s2 + $0x368] sm:$0xff]  ;;  %v839_v43 = vunpack.c.l.b16 %v34_v38 }
  0x83   :  { %1773 = vmatpush.bf16.msra.mxu1 %v2658_v29  ;;  %v2629_v29 = vld [vmem:[%s3427_s2 + $0x1d0] sm:$0xff] }
  0x84   :  { %v855_v46 = vpack.c.b16 %v839_v43, %v839_v43 }
  0x85   :  { %1799 = vmatpush.bf16.msra.mxu3 %v2674_v62  ;;  %v838_v62 = vunpack.c.h.b16 %v3283_v16 }
  0x86   :  { %1761 = vmatpush.bf16.msra.mxu0 %v2649_v33  ;;  %v2628_v33 = vld [vmem:[%s3427_s2 + $0x1c8] sm:$0xff] }
  0x87   :  { %1774 = vmatpush.bf16.msra.mxu1 %v2657_v35  ;;  %v2678_v35 = vld [vmem:[%s3427_s2 + $0x358] sm:$0xff] }
  0x89   :  { %1800 = vmatpush.bf16.msra.mxu3 %v2673_v7  ;;  %v2692_v7 = vld [vmem:[%s3427_s2 + $0x3c8] sm:$0xff] }
  0x8a   :  { %1762 = vmatpush.bf16.msra.mxu0 %v2648_v41  ;;  %v2667_v41 = vld [vmem:[%s3427_s2 + $0x300] sm:$0xff] }
  0x8b   :  { %1775 = vmatpush.bf16.msra.mxu1 %v2656_v44  ;;  %v850_v44 = vpack.c.b16 %v834_v36, %v834_v36 }
  0x8d   :  { %1801 = vmatpush.bf16.msra.mxu3 %v2672_v12 }
  0x8e   :  { %1763 = vmatpush.bf16.msra.mxu0 %v2647_v47  ;;  %v2665_v47 = vld [vmem:[%s3427_s2 + $0x2f0] sm:$0xff] }
  0x8f   :  { %1776 = vmatpush.bf16.msra.mxu1 %v2655_v48  ;;  %v2676_v48 = vld [vmem:[%s3427_s2 + $0x348] sm:$0xff] }
  0x91   :  { %1802 = vmatpush.bf16.msra.mxu3 %v2671_v22 }
  0x92   :  { %1764 = vmatpush.bf16.msra.mxu0 %v2646_v53  ;;  %v2683_v53 = vld [vmem:[%s3427_s2 + $0x380] sm:$0xff] }
  0x93   :  { %1777 = vmatpush.bf16.msra.mxu1 %v2654_v55 }
  0x95   :  { %1803 = vmatpush.bf16.msra.mxu3 %v2670_v26 }
  0x96   :  { %1765 = vmatpush.bf16.msra.mxu0 %v2645_v59  ;;  %v2662_v59 = vld [vmem:[%s3427_s2 + $0x2d8] sm:$0xff] }
  0x97   :  { %1778 = vmatpush.bf16.msra.mxu1 %v2653_v0  ;;  %v2698_v0 = vld [vmem:[%s3427_s2 + $0x3f8] sm:$0xff] }
  0x9a   :  { %1766 = vmatpush.bf16.msra.mxu0 %v2644_v6  ;;  %v2693_v6 = vld [vmem:[%s3427_s2 + $0x3d0] sm:$0xff] }
  0x9b   :  { %1779 = vmatpush.bf16.msra.mxu1 %v2652_v8 }
  0x9e   :  { %v713_v1 = vpop.f32.mrf.mxu0  ;;  %1767 = vmatpush.bf16.msra.mxu0 %v2643_v11 }
  0x9f   :  { %v726_v2 = vpop.f32.mrf.mxu1  ;;  %v714_v30 = vadd.f32 %v2747_v23, %v713_v1  ;;  %v830_v1 = vunpack.c.h.b16 %v3153_v9  ;;  %v2681_v23 = vld [vmem:[%s3427_s2 + $0x370] sm:$0xff] }
  0xa1   :  { %v727_v37 = vadd.f32 %v726_v2, %v714_v30  ;;  %v851_v2 = vpack.c.b16 %v835_v63, %v835_v63  ;;  %v846_v9 = vpack.c.b16 %v830_v1, %v830_v1  ;;  %v2669_v30 = vld [vmem:[%s3427_s2 + $0x310] sm:$0xff]  ;;  %v2659_v63 = vld [vmem:[%s3427_s2 + $0x2c0] sm:$0xff]  ;;  %v854_v1 = vpack.c.b16 %v838_v62, %v838_v62 }
  0xa2   :  { %1812 = vmatpush.bf16.msrb.mxu0 %v2682_v13  ;;  %1804 = vmatpush.bf16.msra.mxu3 %v2669_v30 }
  0xa3   :  { %1755 = vmatmul.bf16.vlgmr.msrb.gmra.mxu3 %v851_v2  ;;  %v2697_v2 = vld [vmem:[%s3427_s2 + $0x3f0] sm:$0xff] }
  0xa6   :  { %v715_v14 = vpop.f32.mrf.mxu0  ;;  %v739_v17 = vpop.f32.mrf.mxu2  ;;  %1813 = vmatpush.bf16.msrb.mxu0 %v2681_v23 }
  0xa7   :  { %v728_v15 = vpop.f32.mrf.mxu1  ;;  %v752_v20 = vpop.f32.mrf.mxu3  ;;  %v740_v45 = vadd.f32 %v739_v17, %v727_v37  ;;  %v836_v14 = vunpack.c.h.b16 %v32_v60  ;;  %v2686_v37 = vld [vmem:[%s3427_s2 + $0x398] sm:$0xff]  ;;  %v2661_v60 = vld [vmem:[%s3427_s2 + $0x2d0] sm:$0xff] }
  0xa8   :  { %v2651_v15 = vld [vmem:[%s3427_s2 + $0x280] sm:$0xff] }
  0xa9   :  { %v753_v49 = vadd.f32 %v752_v20, %v740_v45  ;;  %v852_v17 = vpack.c.b16 %v836_v14, %v836_v14  ;;  %v2631_v20 = vld [vmem:[%s3427_s2 + $0x1e0] sm:$0xff]  ;;  %1780 = vmatpush.bf16.msra.mxu1 %v2651_v15  ;;  %v2685_v45 = vld [vmem:[%s3427_s2 + $0x390] sm:$0xff] }
  0xaa   :  { %1814 = vmatpush.bf16.msrb.mxu0 %v2680_v27 }
  0xab   :  { %1768 = vmatmul.bf16.vlgmr.msra.gmra.mxu0 %v852_v17 }
  0xac   :  { %1781 = vmatmul.bf16.vlgmr.msra.gmra.mxu1 %v853_v21 }
  0xad   :  { %1825 = vmatpush.bf16.msrb.mxu1 %v2690_v18 }
  0xae   :  { %v741_v31 = vpop.f32.mrf.mxu2 }
  0xaf   :  { %v754_v34 = vpop.f32.mrf.mxu3  ;;  %v2679_v31 = vld [vmem:[%s3427_s2 + $0x360] sm:$0xff] }
  0xb0   :  { %v2668_v34 = vld [vmem:[%s3427_s2 + $0x308] sm:$0xff]  ;;  %1815 = vmatpush.bf16.msrb.mxu0 %v2679_v31 }
  0xb1   :  { %1826 = vmatpush.bf16.msrb.mxu1 %v2689_v24  ;;  %1805 = vmatpush.bf16.msra.mxu3 %v2668_v34 }
  0xb4   :  { %1816 = vmatpush.bf16.msrb.mxu0 %v2678_v35 }
  0xb5   :  { %1827 = vmatpush.bf16.msrb.mxu1 %v2688_v28  ;;  %1806 = vmatpush.bf16.msra.mxu3 %v2667_v41 }
  0xb8   :  { %1817 = vmatpush.bf16.msrb.mxu0 %v2677_v42  ;;  %1807 = vmatmul.bf16.vlgmr.msra.gmra.mxu3 %v855_v46  ;;  %v12_v46 = vstv %s3429_s6 }
  0xb9   :  { %1828 = vmatpush.bf16.msrb.mxu1 %v2687_v32  ;;  %13 = vst [vmem:[#allocation2] sm:$0x1] %v12_v46 }
  0xbc   :  { %1818 = vmatpush.bf16.msrb.mxu0 %v2676_v48 }
  0xbd   :  { %1829 = vmatpush.bf16.msrb.mxu1 %v2686_v37 }
  0xbe   :  { %v765_v50 = vpop.f32.mrf.mxu0 }
  0xbf   :  { %v778_v51 = vpop.f32.mrf.mxu1  ;;  %v766_v54 = vadd.f32 %v765_v50, %v753_v49  ;;  %v2684_v49 = vld [vmem:[%s3427_s2 + $0x388] sm:$0xff] }
  0xc0   :  { %v2664_v50 = vld [vmem:[%s3427_s2 + $0x2e8] sm:$0xff] }
  0xc1   :  { %v779_v56 = vadd.f32 %v778_v51, %v766_v54  ;;  %1830 = vmatpush.bf16.msrb.mxu1 %v2685_v45  ;;  %v2675_v51 = vld [vmem:[%s3427_s2 + $0x340] sm:$0xff]  ;;  %v35_v54 = vld [vmem:[%s3428_s0 + $0x38] sm:$0xff] }
  0xc2   :  { %v841_v55 = vunpack.c.l.b16 %v35_v54  ;;  %1819 = vmatpush.bf16.msrb.mxu0 %v2675_v51  ;;  %v842_v8 = vunpack.c.h.b16 %v35_v54 }
  0xc3   :  { %v782_v61 = vmax.f32 %v779_v56, 0.0  ;;  %v2663_v56 = vld [vmem:[%s3427_s2 + $0x2e0] sm:$0xff] }
  0xc4   :  { %v857_v58 = vpack.c.b16 %v841_v55, %v841_v55 }
  0xc5   :  { %815 = vmatmul.f32.vlgmr.msrb.gmra.mxu2 %v782_v61  ;;  %1831 = vmatpush.bf16.msrb.mxu1 %v2684_v49  ;;  %v2660_v61 = vld [vmem:[%s3427_s2 + $0x2c8] sm:$0xff] }
  0xc6   :  { %1734 = vmatpush.bf16.msrb.mxu2 %v2634_v57  ;;  %v767_v3 = vpop.f32.mrf.mxu0  ;;  %v856_v57 = vpack.c.b16 %v840_v52, %v840_v52 }
  0xc7   :  { %v780_v4 = vpop.f32.mrf.mxu1  ;;  %v2696_v3 = vld [vmem:[%s3427_s2 + $0x3e8] sm:$0xff]  ;;  %v1652_v11 = vpop.f32.mrf.mxu3 }
  0xc8   :  { %1820 = vmatmul.bf16.vlgmr.msrb.gmra.mxu0 %v856_v57  ;;  %v2695_v4 = vld [vmem:[%s3427_s2 + $0x3e0] sm:$0xff] }
  0xc9   :  { %1832 = vmatpush.bf16.msrb.mxu1 %v2683_v53 }
  0xca   :  { %1735 = vmatpush.bf16.msrb.mxu2 %v2633_v5  ;;  %v2694_v5 = vld [vmem:[%s3427_s2 + $0x3d8] sm:$0xff] }
  0xcc   :  { %1833 = vmatmul.bf16.vlgmr.msrb.gmra.mxu1 %v857_v58  ;;  %v2748_v58 = vld [vmem:[#allocation2] ss:$0 sm:$0xff] }
  0xcd   :  { %1690 = vmatmul.bf16.vlgmr.msra.gmra.mxu2 %v846_v9  ;;  %v2691_v9 = vld [vmem:[%s3427_s2 + $0x3c0] sm:$0xff] }
  0xce   :  { %1736 = vmatpush.bf16.msrb.mxu2 %v2632_v10  ;;  %v858_v10 = vpack.c.b16 %v842_v8, %v842_v8 }
  0xcf   :  { %v1654_v14 = vpop.f32.mrf.mxu3 }
  0xd2   :  { %1737 = vmatpush.bf16.msrb.mxu2 %v2631_v20 }
  0xd6   :  { %1738 = vmatpush.bf16.msrb.mxu2 %v2630_v25 }
  0xda   :  { %1739 = vmatpush.bf16.msrb.mxu2 %v2629_v29 }
  0xde   :  { %1740 = vmatpush.bf16.msrb.mxu2 %v2628_v33 }
  0xdf   :  { %v1678_v13 = vpop.f32.mrf.mxu1 }
  0xe0   :  { %v1665_v12 = vpop.f32.mrf.mxu0 }
  0xe2   :  { %1741 = vmatpush.bf16.msrb.mxu2 %v2627_v39 }
  0xe5   :  { %1742 = vmatmul.bf16.vlgmr.msrb.gmra.mxu2 %v850_v44 }
  0xe6   :  { %1786 = vmatpush.bf16.msra.mxu2 %v2666_v40 }
  0xe7   :  { %v1680_v16 = vpop.f32.mrf.mxu1  ;;  %v1704_v17 = vpop.f32.mrf.mxu3 }
  0xe8   :  { %v1667_v15 = vpop.f32.mrf.mxu0 }
  0xea   :  { %1787 = vmatpush.bf16.msra.mxu2 %v2665_v47 }
  0xee   :  { %1788 = vmatpush.bf16.msra.mxu2 %v2664_v50 }
  0xef   :  { %v1706_v20 = vpop.f32.mrf.mxu3 }
  0xf2   :  { %1789 = vmatpush.bf16.msra.mxu2 %v2663_v56 }
  0xf6   :  { %1790 = vmatpush.bf16.msra.mxu2 %v2662_v59 }
  0xfa   :  { %1791 = vmatpush.bf16.msra.mxu2 %v2661_v60 }
  0xfe   :  { %1792 = vmatpush.bf16.msra.mxu2 %v2660_v61  ;;  %v1717_v18 = vpop.f32.mrf.mxu0 }
  0xff   :  { %v1730_v19 = vpop.f32.mrf.mxu1 }
 0x102   :  { %1793 = vmatpush.bf16.msra.mxu2 %v2659_v63 }
 0x105   :  { %1794 = vmatmul.bf16.vlgmr.msra.gmra.mxu2 %v854_v1 }
 0x106   :  { %1838 = vmatpush.bf16.msrb.mxu2 %v2698_v0  ;;  %v1719_v21 = vpop.f32.mrf.mxu0 }
 0x107   :  { %v1732_v22 = vpop.f32.mrf.mxu1 }
 0x10a   :  { %1839 = vmatpush.bf16.msrb.mxu2 %v2697_v2 }
 0x10e   :  { %1840 = vmatpush.bf16.msrb.mxu2 %v2696_v3 }
 0x112   :  { %1841 = vmatpush.bf16.msrb.mxu2 %v2695_v4 }
 0x116   :  { %1842 = vmatpush.bf16.msrb.mxu2 %v2694_v5 }
 0x11a   :  { %1843 = vmatpush.bf16.msrb.mxu2 %v2693_v6 }
 0x11e   :  { %1844 = vmatpush.bf16.msrb.mxu2 %v2692_v7 }
 0x122   :  { %1845 = vmatpush.bf16.msrb.mxu2 %v2691_v9 }
 0x125   :  { %1846 = vmatmul.bf16.vlgmr.msrb.gmra.mxu2 %v858_v10 }
 0x126   :  { %v1756_v26 = vpop.f32.mrf.mxu3 }
 0x128   :  { %v1769_v28 = vpop.f32.mrf.mxu0 }
 0x129   :  { %v1782_v30 = vpop.f32.mrf.mxu1 }
 0x12e   :  { %v1758_v33 = vpop.f32.mrf.mxu3 }
 0x130   :  { %v1771_v35 = vpop.f32.mrf.mxu0 }
 0x131   :  { %v1784_v39 = vpop.f32.mrf.mxu1 }
 0x13b   :  { %v1808_v38 = vpop.f32.mrf.mxu3 }
 0x143   :  { %v1810_v49 = vpop.f32.mrf.mxu3 }
 0x145   :  { %v1821_v43 = vpop.f32.mrf.mxu0 }
 0x148   :  { %v816_v23 = vpop.f32.mrf.mxu2 }
 0x149   :  { %v1653_v24 = vadd.f32 %v1652_v11, %v816_v23  ;;  %v1834_v45 = vpop.f32.mrf.mxu1 }
 0x14b   :  { %v1666_v25 = vadd.f32 %v1665_v12, %v1653_v24 }
 0x14d   :  { %v1679_v27 = vadd.f32 %v1678_v13, %v1666_v25  ;;  %v1823_v50 = vpop.f32.mrf.mxu0 }
 0x150   :  { %v1691_v29 = vpop.f32.mrf.mxu2 }
 0x151   :  { %v1692_v31 = vadd.f32 %v1691_v29, %v1679_v27  ;;  %v1836_v51 = vpop.f32.mrf.mxu1 }
 0x153   :  { %v1705_v32 = vadd.f32 %v1704_v17, %v1692_v31 }
 0x155   :  { %v1718_v34 = vadd.f32 %v1717_v18, %v1705_v32 }
 0x157   :  { %v1731_v36 = vadd.f32 %v1730_v19, %v1718_v34 }
 0x158   :  { %v1693_v37 = vpop.f32.mrf.mxu2 }
 0x168   :  { %v1743_v40 = vpop.f32.mrf.mxu2 }
 0x169   :  { %v1744_v41 = vadd.f32 %v1743_v40, %v1731_v36 }
 0x16b   :  { %v1757_v42 = vadd.f32 %v1756_v26, %v1744_v41 }
 0x16d   :  { %v1770_v44 = vadd.f32 %v1769_v28, %v1757_v42 }
 0x16f   :  { %v1783_v47 = vadd.f32 %v1782_v30, %v1770_v44 }
 0x170   :  { %v1745_v48 = vpop.f32.mrf.mxu2 }
 0x188   :  { %v1795_v52 = vpop.f32.mrf.mxu2 }
 0x189   :  { %v1796_v54 = vadd.f32 %v1795_v52, %v1783_v47 }
 0x18b   :  { %v1809_v55 = vadd.f32 %v1808_v38, %v1796_v54 }
 0x18d   :  { %v1822_v56 = vadd.f32 %v1821_v43, %v1809_v55 }
 0x18f   :  { %v1835_v57 = vadd.f32 %v1834_v45, %v1822_v56 }
 0x190   :  { %v1797_v53 = vpop.f32.mrf.mxu2 }
 0x1a8   :  { %v1847_v59 = vpop.f32.mrf.mxu2 }
 0x1a9   :  { %v1848_v60 = vadd.f32 %v1847_v59, %v1835_v57 }
 0x1ab   :  { %v1855_v61 = vadd.f32 %v2748_v58, %v1848_v60 }
 0x1ad   :  { %v1856_v62 = vsub.f32 0.0, %v1855_v61 }
 0x1af   :  { %v1857_v63 = vmul.f32 1.442695, %v1856_v62 }
 0x1b0   :  { %v1849_v0 = vpop.f32.mrf.mxu2 }
 0x1b1   :  { %2749 = vpow2.f32 %v1857_v63 }
 0x1b7   :  { %v2750_v1 = vpop.eup %2749 }
 0x1b8   :  { %v1859_v2 = vadd.f32 1.0, %v2750_v1 }
 0x1ba   :  { %2751 = vrcp.f32 %v1859_v2 }
 0x1c0   :  { %v2752_v3 = vpop.eup %2751 }
 0x1c1   :  { %1862 = vst.msk [vmem:[%s3430_s7] sm:$0xff] %vm1861_vm0, %v2752_v3 }

</bundles_post_ra>
